<compile_context>
chip_gen: v7x
topology: tpu7x:2x2x1
jax: 0.10.0
libtpu: 0.0.40
codegen_flags: <defaults>
</compile_context>

<pallas_src>
import jax
import jax.numpy as jnp
from jax import lax
from jax.experimental import pallas as pl
from jax.experimental.pallas import tpu as pltpu

IGNORE_INDEX = -1


def _pick_rows_per_block(rows, r_budget, align):
    """Rows (of 128 pixels) per grid step.

    Prefer a divisor of `rows` (no ragged tail block -> no in-kernel tail
    mask); otherwise fall back to an aligned cap and let the kernel mask the
    last block."""
    if rows <= r_budget:
        return rows                           # full extent -> always layout-legal
    r = max(align, (r_budget // align) * align)
    for cand in range(r, align - 1, -align):  # trace-time search, a few k iters max
        if rows % cand == 0:
            return cand
    return r


def _make_weighted_ce_kernel(C, R, rows_total, need_tail, class_weights):
    """Kernel factory; all arguments are static (trace time)."""
    class_weights = tuple(float(w) for w in class_weights)

    def kernel(logits_ref, tgt_ref, out_ref):
        # logits_ref: (1, C, R, 128)  native dtype
        # tgt_ref:    (1, 1, R, 128)  int8 or int32
        # out_ref:    (1, 1, 8, 128)  f32; row 0 = weighted-NLL partial,
        #                             row 1 = weight-normalizer partial.
        t = tgt_ref[0, 0].astype(jnp.int32)                  # (R, 128)
        valid = t != IGNORE_INDEX
        if need_tail:                                        # static: only if ragged
            row = lax.broadcasted_iota(jnp.int32, t.shape, 0) + pl.program_id(1) * R
            valid = jnp.logical_and(valid, row < rows_total)

        # Max over classes: unrolled loop over the leading C axis (VPU only).
        m = logits_ref[0, 0].astype(jnp.float32)
        for c in range(1, C):
            m = jnp.maximum(m, logits_ref[0, c].astype(jnp.float32))

        sumexp = None
        picked = 0.0        # x[target]            (irrelevant where wt == 0)
        wt = 0.0            # class_weight[target]
        for c in range(C):
            xc = logits_ref[0, c].astype(jnp.float32)
            e = jnp.exp(xc - m)
            sumexp = e if sumexp is None else sumexp + e
            wc = class_weights[c]
            if wc != 0.0:                # zero-weight classes contribute nothing
                eq = t == c
                picked = jnp.where(eq, xc, picked)
                wt = jnp.where(eq, wc, wt)

        lse = m + jnp.log(sumexp)
        # jnp.where (select) so garbage in masked tail rows can't NaN-poison.
        wnll = jnp.where(valid, (lse - picked) * wt, 0.0)
        wmask = jnp.where(valid, wt, 0.0)

        # Only the sublane (row) reduction in-kernel; cross-lane reduction of
        # the tiny partials array happens once in the wrapper.
        out_ref[0, 0, 0:1, :] = jnp.sum(wnll, axis=0, keepdims=True)
        out_ref[0, 0, 1:2, :] = jnp.sum(wmask, axis=0, keepdims=True)
        # Rows 2..7 of the output tile are never read by the wrapper.

    return kernel


def weighted_ce_loss_pallas(logits_nchw, target_nhw, class_weight):
    """CrossEntropyLoss(weight=class_weight, ignore_index=-1, reduction='mean').

    class_weight is treated as a trace-time constant (it is the fixed [0, 1]
    tensor built in FSweightCELoss.__init__)."""
    N, C, H, W = logits_nchw.shape
    HW = H * W
    weights = [float(w) for w in class_weight]
    assert len(weights) == C

    # NCHW is contiguous -> (N, C, HW) reshape is free; lay pixels out as
    # (rows, 128) so every block is lane-dense on its last two dims.
    logits = logits_nchw.reshape(N, C, HW)
    tgt = target_nhw.reshape(N, HW)
    pad = (-HW) % 128
    if pad:
        # TODO(synk): only taken when H*W % 128 != 0; costs one copy of the logits.
        logits = jnp.pad(logits, ((0, 0), (0, 0), (0, pad)))
        tgt = jnp.pad(tgt, ((0, 0), (0, pad)), constant_values=IGNORE_INDEX)
    rows = (HW + pad) // 128

    # Narrow target dtype to cut HBM read bytes on mem-bound generations.
    use_i8 = (C <= 127) and (rows % 32 == 0)
    tgt_dtype = jnp.int8 if use_i8 else jnp.int32
    logits = logits.reshape(N, C, rows, 128)                 # native dtype streamed
    tgt = tgt.astype(tgt_dtype).reshape(N, 1, rows, 128)

    # Per-generation VMEM budget (double-buffered logits + target blocks).
    try:
        phys_vmem = int(pltpu.get_tpu_info().vmem_capacity_bytes)
    except Exception:
        phys_vmem = 64 * 1024 * 1024                         # conservative (v7x-sized)
    total_budget = (24 << 20) if phys_vmem <= (64 << 20) else (40 << 20)

    l_item = jnp.dtype(logits.dtype).itemsize
    t_item = jnp.dtype(tgt_dtype).itemsize
    per_row = 2 * 128 * (C * l_item + t_item)                # 2x = double buffering
    r_budget = max(8, total_budget // per_row)
    align = 32 if t_item == 1 else 8                         # int8 packs 32 sublanes
    R = _pick_rows_per_block(rows, r_budget, align)
    grid_pix = pl.cdiv(rows, R)
    need_tail = (rows % R) != 0

    kernel = _make_weighted_ce_kernel(C, R, rows, need_tail, weights)

    n_pix = N * rows * 128
    cost = pl.CostEstimate(
        flops=n_pix * (6 * C + 10),
        transcendentals=n_pix * (C + 1),
        bytes_accessed=int(logits.size) * l_item + int(tgt.size) * t_item
        + N * grid_pix * 8 * 128 * 4,
    )

    partials = pl.pallas_call(
        kernel,
        out_shape=jax.ShapeDtypeStruct((N, grid_pix, 8, 128), jnp.float32),
        grid=(N, grid_pix),
        in_specs=[
            pl.BlockSpec((1, C, R, 128), lambda n, p: (n, 0, p, 0)),
            pl.BlockSpec((1, 1, R, 128), lambda n, p: (n, 0, p, 0)),
        ],
        out_specs=pl.BlockSpec((1, 1, 8, 128), lambda n, p: (n, p, 0, 0)),
        compiler_params=pltpu.CompilerParams(
            dimension_semantics=("parallel", "parallel"),
            vmem_limit_bytes=min(phys_vmem * 3 // 4, 96 << 20),
        ),
        cost_estimate=cost,
    )(logits, tgt)

    # Single fused reduction over the tiny lane-dense partials array.
    totals = jnp.sum(partials[:, :, 0:2, :], axis=(0, 1, 3))    # (2,)
    # NOTE: matches PyTorch semantics — all-ignored / all-zero-weight input
    # gives 0/0 = NaN, same as torch.
    return totals[0] / totals[1]


def _scale_target_nearest(t_nhw, out_h, out_w):
    """torch F.interpolate(mode='nearest') on an integer label map."""
    _, in_h, in_w = t_nhw.shape
    rows = (jnp.arange(out_h) * in_h) // out_h
    cols = (jnp.arange(out_w) * in_w) // out_w
    return t_nhw[:, rows[:, None], cols[None, :]]


def fs_weight_ce_loss(inputs, target, class_weight, weights=None):
    """FSweightCELoss.forward.

    inputs: (N, C, H, W) logits, or a list/tuple of such tensors
    target: (N, 1, Ht, Wt) integer label map
    """
    if isinstance(inputs, (list, tuple)):
        if weights is None:
            weights = [1.0] * len(inputs)
        loss = 0.0
        for i, inp in enumerate(inputs):
            _, _, H, W = inp.shape
            t = _scale_target_nearest(jnp.squeeze(target, axis=1), H, W)
            loss = loss + weights[i] * weighted_ce_loss_pallas(inp, t, class_weight)
        return loss
    _, _, H, W = inputs.shape
    t = _scale_target_nearest(jnp.squeeze(target, axis=1), H, W)
    return weighted_ce_loss_pallas(inputs, t, class_weight)


def _ref_loss(inputs, target, class_weight):
    """Pure-JAX reference of weighted CE with ignore_index=-1, mean reduction."""
    N, C, H, W = inputs.shape
    t = _scale_target_nearest(jnp.squeeze(target, axis=1), H, W).reshape(-1)
    logits = jnp.transpose(inputs, (0, 2, 3, 1)).reshape(-1, C)
    valid = t != IGNORE_INDEX
    ts = jnp.where(valid, t, 0)
    logp = jax.nn.log_softmax(logits.astype(jnp.float32), axis=-1)
    nll = -jnp.take_along_axis(logp, ts[:, None], axis=1)[:, 0]
    wv = class_weight[ts] * valid.astype(jnp.float32)
    return jnp.sum(nll * wv) / jnp.sum(wv)


if __name__ == "__main__":
    key = jax.random.PRNGKey(0)
    k1, k2 = jax.random.split(key)

    # Deterministic "parameter" from __init__: class weights [0, 1] -> C = 2.
    class_weight = jnp.array([0.0, 1.0], dtype=jnp.float32)

    N, C, H, W = 2, 2, 16, 16          # logits
    Ht, Wt = 8, 8                      # coarser target map (exercises nearest resize)

    logits = jax.random.normal(k1, (N, C, H, W), dtype=jnp.float32)
    target = jax.random.randint(k2, (N, 1, Ht, Wt), -1, C, dtype=jnp.int32)

    loss = fs_weight_ce_loss(logits, target, class_weight)
    loss = jax.block_until_ready(loss)

    ref = _ref_loss(logits, target, class_weight)
    assert jnp.allclose(loss, ref, rtol=1e-5, atol=1e-5), (loss, ref)

    print("KERNEL_OK")
</pallas_src>

<mosaic_0001>
module attributes {stable_mosaic.version = 11 : i64} {
  func.func @kernel(%arg0: i32, %arg1: i32, %arg2: memref<1x2x2x128xf32, #tpu.memory_space<vmem>>, %arg3: memref<1x1x2x128xi32, #tpu.memory_space<vmem>>, %arg4: memref<1x1x8x128xf32, #tpu.memory_space<vmem>>) attributes {dimension_semantics = [#tpu.dimension_semantics<parallel>, #tpu.dimension_semantics<parallel>], iteration_bounds = array<i64: 2, 1>, scalar_prefetch = 0 : i64, scratch_operands = 0 : i64, tpu.core_type = #tpu.core_type<tc>, window_params = [{transform_indices = @transform_0, window_bounds = array<i64: 1, 2, 2, 128>}, {transform_indices = @transform_1, window_bounds = array<i64: 1, 1, 2, 128>}, {transform_indices = @transform_2, window_bounds = array<i64: 1, 1, 8, 128>}]} {
    %c0 = arith.constant 0 : index
    %c0_0 = arith.constant 0 : index
    %c0_1 = arith.constant 0 : index
    %c0_2 = arith.constant 0 : index
    %0 = vector.load %arg3[%c0, %c0_0, %c0_1, %c0_2] : memref<1x1x2x128xi32, #tpu.memory_space<vmem>>, vector<1x1x2x128xi32>
    %1 = vector.shape_cast %0 : vector<1x1x2x128xi32> to vector<2x128xi32>
    %c-1_i32 = arith.constant -1 : i32
    %2 = vector.broadcast %c-1_i32 : i32 to vector<2x128xi32>
    %3 = arith.cmpi ne, %1, %2 : vector<2x128xi32>
    %c0_3 = arith.constant 0 : index
    %c0_4 = arith.constant 0 : index
    %c0_5 = arith.constant 0 : index
    %c0_6 = arith.constant 0 : index
    %4 = vector.load %arg2[%c0_3, %c0_4, %c0_5, %c0_6] : memref<1x2x2x128xf32, #tpu.memory_space<vmem>>, vector<1x1x2x128xf32>
    %5 = vector.shape_cast %4 : vector<1x1x2x128xf32> to vector<2x128xf32>
    %c0_7 = arith.constant 0 : index
    %c1 = arith.constant 1 : index
    %c0_8 = arith.constant 0 : index
    %c0_9 = arith.constant 0 : index
    %6 = vector.load %arg2[%c0_7, %c1, %c0_8, %c0_9] : memref<1x2x2x128xf32, #tpu.memory_space<vmem>>, vector<1x1x2x128xf32>
    %7 = vector.shape_cast %6 : vector<1x1x2x128xf32> to vector<2x128xf32>
    %8 = arith.maximumf %5, %7 : vector<2x128xf32>
    %c0_10 = arith.constant 0 : index
    %c0_11 = arith.constant 0 : index
    %c0_12 = arith.constant 0 : index
    %c0_13 = arith.constant 0 : index
    %9 = vector.load %arg2[%c0_10, %c0_11, %c0_12, %c0_13] : memref<1x2x2x128xf32, #tpu.memory_space<vmem>>, vector<1x1x2x128xf32>
    %10 = vector.shape_cast %9 : vector<1x1x2x128xf32> to vector<2x128xf32>
    %11 = arith.subf %10, %8 : vector<2x128xf32>
    %12 = math.exp %11 : vector<2x128xf32>
    %c0_14 = arith.constant 0 : index
    %c1_15 = arith.constant 1 : index
    %c0_16 = arith.constant 0 : index
    %c0_17 = arith.constant 0 : index
    %13 = vector.load %arg2[%c0_14, %c1_15, %c0_16, %c0_17] : memref<1x2x2x128xf32, #tpu.memory_space<vmem>>, vector<1x1x2x128xf32>
    %14 = vector.shape_cast %13 : vector<1x1x2x128xf32> to vector<2x128xf32>
    %15 = arith.subf %14, %8 : vector<2x128xf32>
    %16 = math.exp %15 : vector<2x128xf32>
    %17 = arith.addf %12, %16 : vector<2x128xf32>
    %c1_i32 = arith.constant 1 : i32
    %18 = vector.broadcast %c1_i32 : i32 to vector<2x128xi32>
    %19 = arith.cmpi eq, %1, %18 : vector<2x128xi32>
    %cst = arith.constant 0.000000e+00 : f32
    %20 = vector.broadcast %cst : f32 to vector<2x128xf32>
    %21 = arith.select %19, %14, %20 : vector<2x128xi1>, vector<2x128xf32>
    %cst_18 = arith.constant 1.000000e+00 : f32
    %cst_19 = arith.constant 0.000000e+00 : f32
    %22 = vector.broadcast %cst_18 : f32 to vector<2x128xf32>
    %23 = vector.broadcast %cst_19 : f32 to vector<2x128xf32>
    %24 = arith.select %19, %22, %23 : vector<2x128xi1>, vector<2x128xf32>
    %25 = math.log %17 : vector<2x128xf32>
    %26 = arith.addf %8, %25 : vector<2x128xf32>
    %27 = arith.subf %26, %21 : vector<2x128xf32>
    %28 = arith.mulf %27, %24 : vector<2x128xf32>
    %cst_20 = arith.constant 0.000000e+00 : f32
    %29 = vector.broadcast %cst_20 : f32 to vector<2x128xf32>
    %30 = arith.select %3, %28, %29 : vector<2x128xi1>, vector<2x128xf32>
    %cst_21 = arith.constant 0.000000e+00 : f32
    %31 = vector.broadcast %cst_21 : f32 to vector<2x128xf32>
    %32 = arith.select %3, %24, %31 : vector<2x128xi1>, vector<2x128xf32>
    %cst_22 = arith.constant dense<0.000000e+00> : vector<128xf32>
    %33 = vector.multi_reduction <add>, %30, %cst_22 [0] : vector<2x128xf32> to vector<128xf32>
    %34 = vector.shape_cast %33 : vector<128xf32> to vector<1x128xf32>
    %c0_23 = arith.constant 0 : index
    %c0_24 = arith.constant 0 : index
    %c0_25 = arith.constant 0 : index
    %c0_26 = arith.constant 0 : index
    %35 = vector.load %arg4[%c0_23, %c0_24, %c0_25, %c0_26] : memref<1x1x8x128xf32, #tpu.memory_space<vmem>>, vector<1x1x1x128xf32>
    %36 = vector.shape_cast %35 : vector<1x1x1x128xf32> to vector<1x128xf32>
    %37 = vector.shape_cast %34 : vector<1x128xf32> to vector<1x1x1x128xf32>
    tpu.vector_store %arg4[%c0_23, %c0_24, %c0_25, %c0_26], %37 {strides = array<i32>} : memref<1x1x8x128xf32, #tpu.memory_space<vmem>>, vector<1x1x1x128xf32>,
    %cst_27 = arith.constant dense<0.000000e+00> : vector<128xf32>
    %38 = vector.multi_reduction <add>, %32, %cst_27 [0] : vector<2x128xf32> to vector<128xf32>
    %39 = vector.shape_cast %38 : vector<128xf32> to vector<1x128xf32>
    %c0_28 = arith.constant 0 : index
    %c0_29 = arith.constant 0 : index
    %c1_30 = arith.constant 1 : index
    %c0_31 = arith.constant 0 : index
    %40 = vector.load %arg4[%c0_28, %c0_29, %c1_30, %c0_31] : memref<1x1x8x128xf32, #tpu.memory_space<vmem>>, vector<1x1x1x128xf32>
    %41 = vector.shape_cast %40 : vector<1x1x1x128xf32> to vector<1x128xf32>
    %42 = vector.shape_cast %39 : vector<1x128xf32> to vector<1x1x1x128xf32>
    tpu.vector_store %arg4[%c0_28, %c0_29, %c1_30, %c0_31], %42 {strides = array<i32>} : memref<1x1x8x128xf32, #tpu.memory_space<vmem>>, vector<1x1x1x128xf32>,
    return
  }
  func.func @transform_0(%arg0: i32, %arg1: i32) -> (i32, i32, i32, i32) {
    %c0_i32 = arith.constant 0 : i32
    %c0_i32_0 = arith.constant 0 : i32
    %c0_i32_1 = arith.constant 0 : i32
    return %arg0, %c0_i32, %arg1, %c0_i32_0 : i32, i32, i32, i32
  }
  func.func @transform_1(%arg0: i32, %arg1: i32) -> (i32, i32, i32, i32) {
    %c0_i32 = arith.constant 0 : i32
    %c0_i32_0 = arith.constant 0 : i32
    %c0_i32_1 = arith.constant 0 : i32
    return %arg0, %c0_i32, %arg1, %c0_i32_0 : i32, i32, i32, i32
  }
  func.func @transform_2(%arg0: i32, %arg1: i32) -> (i32, i32, i32, i32) {
    %c0_i32 = arith.constant 0 : i32
    %c0_i32_0 = arith.constant 0 : i32
    %c0_i32_1 = arith.constant 0 : i32
    return %arg0, %arg1, %c0_i32, %c0_i32_0 : i32, i32, i32, i32
  }
}

</mosaic_0001>

<bundles_post_ra>
// kernel: tpu_custom_call.1
= control target key start
LH: loop header
LB: loop body
LE: loop exit
PB: predicated region body
PF: predicated region fallthrough
CT: control target
= control target key end

     0   :  { %7 = vsyncpa [#allocation3], 0  ;;  %s865_s0 = inlined_call_operand.hbm [shape: f32[2,2,2,128], index: 0, kind: input, shape index: {}]   ;;  %s866_s1 = inlined_call_operand.hbm [shape: s32[2,1,2,128], index: 1, kind: input, shape index: {}]   ;;  %s867_s2 = inlined_call_operand.hbm [shape: f32[2,1,8,128], index: 2, kind: output, shape index: {}]  }
   0x1   :  { %9 = vsyncpa [#allocation3 + $0x1], 0 }
   0x2   :  { %10 = vsyncpa [#allocation6], 0 }
   0x3   :  { %12 = vsyncpa [#allocation6 + $0x1], 0 }
   0x4   :  { %13 = vsyncpa [#allocation4], 0 }
   0x5   :  { %15 = vsyncpa [#allocation4 + $0x1], 0  ;;  %s643_s9 = smov 0   ;;  %s645_s10 = smov 0  }
   0x6   :  { %s647_s11 = smov 0   ;;  %s649_s12 = smov 0  }
   0x7   :  { %s651_s13 = smov 0   ;;  %s653_s14 = smov 0  }
   0x8 LB: > { %s379_s15 = sadd.s32 4294967295, %s620_s14   ;;  %s380_s16 = sadd.s32 4294967294, %s620_s14   ;;  %s620_s14 = sphi %s653_s14, %s21_s14   ;;  %s616_s13 = sphi %s651_s13, %s886_s13   ;;  %s612_s12 = sphi %s649_s12, %s885_s12   ;;  %s608_s11 = sphi %s647_s11, %s884_s11   ;;  %s604_s10 = sphi %s645_s10, %s883_s10   ;;  %s600_s9 = sphi %s643_s9, %s882_s9  }
   0x9   : > { %s33_s17 = sadd.s32 1, %s616_s13  ;;  %s42_s18 = sadd.s32 1, %s608_s11 }
   0xa   : > { %p35_p0 = scmp.ge.s32.totalorder %s33_s17, 2  ;;  %p49_p1 = scmp.ne.s32.totalorder %s608_s11, %s604_s10 }
   0xb   : > { %p50_p2 = scmp.eq.s32.totalorder %s620_s14, 0  ;;  %p55_p3 = scmp.ne.s32.totalorder %s604_s10, %s600_s9 }
   0xc   : > { %s888_s17 = smov (%p35_p0, %s33_s17), 0  ;;  %p56_p5 = scmp.eq.s32.totalorder %s379_s15, 0 }
   0xd   : > { %p684_p4 = por %p50_p2, %p49_p1  ;;  %s37_s20 = ssub.s32 %s616_s13, %s888_s17 }
   0xe   : > { %p109_p6 = scmp.eq.s32.totalorder %s379_s15, 1  ;;  %p40_p7 = scmp.eq.s32.totalorder %s37_s20, 0 }
   0xf   : > { %p690_p8 = por %p56_p5, %p55_p3  ;;  %p115_p10 = scmp.eq.s32.totalorder %s380_s16, 1 }
  0x10   : > { %p694_p9 = por %p109_p6, %p49_p1  ;;  %p415_p13 = scmp.lt.s32.totalorder %s620_s14, 2 }
  0x11   : > { %s871_s21 = scalar_select %p690_p8, 1, 0 }
  0x12   : > { %s872_s22 = scalar_select %p694_p9, 1, 0 }
  0x13   : > { %s699_s23 = scalar_select %p40_p7, %s608_s11, %s42_s18  }
  0x14   : > { %p701_p11 = por %p115_p10, %p55_p3  ;;  %s708_s25 = sand.u32 1, %s608_s11  }
  0x15   : > { %s383_s26 = sshll.u32 %s708_s25, 2  ;;  %s397_s27 = sshll.u32 %s616_s13, 6 }
  0x16   : > { %s873_s24 = scalar_select %p701_p11, 1, 0 }
  0x17   : > { %s715_s30 = scalar_lea.hbm %s865_s0, %s397_s27  ;;  %s139_s3 = scalar_lea.vmem [#allocation2], %s383_s26 }
  0x18   : > { %s147_s4 = sshll.u32 %s139_s3, 4  ;;  %p721_p0 = pnand %p415_p13, %p684_p4  ;;  %s717_s4 = int_to_ptr.vmem [resolvable:$true] %s147_s4 }
  0x19   : > { %s136_s6 = scalar_lea.sflag [#allocation3], %s708_s25  ;;  %s474_s7 = scalar_lea.hbm %s715_s30, 64 }
  0x1a   : > { %p475_p2 = scmp.ne.s32.totalorder %s715_s30, %s474_s7  ;;  %p476_p3 = pneg %p721_p0 }
  0x1b   : > { %s479_s16 = scalar_lea.hbm %s865_s0, 128  ;;  %p480_p4 = scmp.lt.u32.totalorder %s715_s30, %s865_s0 }
  0x1c   : > { %p477_p5 = pnand %p476_p3, %p475_p2  ;;  %p481_p7 = scmp.lt.u32.totalorder %s479_s16, %s474_s7 }
  0x1d   : > { %p483_p13 = scmp.lt.u32.totalorder %s474_s7, %s715_s30 }
  0x1e   : > { %p478_p6 = pneg %p477_p5  ;;  %p482_p10 = por %p481_p7, %p480_p4 }
  0x20   : > { %p484_p12 = por %p483_p13, %p482_p10 }
  0x22   : > { %p485_p1 = pnand %p484_p12, %p478_p6 }
  0x24   : > { %488 = shalt.err (!%p485_p1)
}
  0x25   : > { %s489_s20 = scalar_lea.vmem %s717_s4, 64  ;;  %s622_s26 = smov [#allocation2]  }
  0x26   : > { %p490_p2 = scmp.ne.s32.totalorder %s717_s4, %s489_s20  ;;  %s494_s27 = sshll.u32 %s622_s26, 4  ;;  %s495_s27 = int_to_ptr.vmem [resolvable:$false] %s494_s27 }
  0x27   : > { %s496_s28 = scalar_lea.vmem %s495_s27, 128  ;;  %p497_p9 = scmp.lt.s32.totalorder %s717_s4, %s495_s27 }
  0x28   : > { %p492_p5 = pnand %p490_p2, %p476_p3  ;;  %p498_p4 = scmp.lt.s32.totalorder %s496_s28, %s489_s20 }
  0x2a   : > { %p493_p11 = pneg %p492_p5  ;;  %p499_p7 = por %p498_p4, %p497_p9 }
  0x2c   : > { %p500_p10 = pnand %p499_p7, %p493_p11 }
  0x2e   : > { %503 = shalt.err (!%p500_p10)
}
  0x2f   : > { %s623_s29 = smov 32   ;;  %s624_s3 = smov 2  }
  0x30   : > { %407 = dma.hbm_to_vmem [thread:$0]  (!%p721_p0), %s715_s30, 64, %s717_s4, %s136_s6, %s623_s29, %s623_s29, %s624_s3  }
  0x31   : > { %p174_p12 = scmp.lt.s32.totalorder %s620_s14, 3  ;;  %s386_s7 = sshll.u32 %s708_s25, 1 }
  0x32   : > { %s387_s8 = sshll.u32 %s616_s13, 5  ;;  %p875_p9 = scmp.ge.s32.totalorder %s620_s14, 1 }
  0x33   : > { %s766_s19 = scalar_lea.hbm %s866_s1, %s387_s8  ;;  %s161_s20 = scalar_lea.vmem [#allocation5], %s386_s7 }
  0x34   : > { %p759_p11 = pnand %p875_p9, %p174_p12  ;;  %s169_s26 = sshll.u32 %s161_s20, 4  ;;  %s170_s26 = int_to_ptr.vmem [resolvable:$true] %s169_s26 }
  0x35   : > { %s158_s30 = scalar_lea.sflag [#allocation6], %s708_s25  ;;  %s504_s4 = scalar_lea.hbm %s766_s19, 32 }
  0x36   : > { %s876_s15 = scalar_select %p759_p11, 1, 0 }
  0x37   : > { %p505_p1 = scmp.ne.s32.totalorder %s766_s19, %s504_s4  ;;  %s509_s28 = scalar_lea.hbm %s866_s1, 64 }
  0x38   : > { %p510_p2 = scmp.lt.u32.totalorder %s766_s19, %s866_s1  ;;  %p511_p5 = scmp.lt.u32.totalorder %s509_s28, %s504_s4 }
  0x39   : > { %p507_p6 = pnand %p505_p1, %p476_p3  ;;  %p513_p7 = scmp.lt.u32.totalorder %s504_s4, %s766_s19 }
  0x3a   : > { %p512_p4 = por %p511_p5, %p510_p2 }
  0x3b   : > { %p508_p13 = pneg %p507_p6 }
  0x3c   : > { %p514_p10 = por %p513_p7, %p512_p4 }
  0x3e   : > { %p515_p12 = pnand %p514_p10, %p508_p13 }
  0x40   : > { %518 = shalt.err (!%p515_p12)
}
  0x41   : > { %s519_s25 = scalar_lea.vmem %s170_s26, 32  ;;  %s625_s7 = smov [#allocation5]  }
  0x42   : > { %p520_p9 = scmp.ne.s32.totalorder %s170_s26, %s519_s25  ;;  %s524_s8 = sshll.u32 %s625_s7, 4  ;;  %s525_s8 = int_to_ptr.vmem [resolvable:$false] %s524_s8 }
  0x43   : > { %s526_s16 = scalar_lea.vmem %s525_s8, 64  ;;  %p527_p8 = scmp.lt.s32.totalorder %s170_s26, %s525_s8 }
  0x44   : > { %p522_p1 = pnand %p520_p9, %p476_p3  ;;  %p528_p11 = scmp.lt.s32.totalorder %s526_s16, %s519_s25 }
  0x46   : > { %p523_p6 = pneg %p522_p1  ;;  %p529_p2 = por %p528_p11, %p527_p8 }
  0x48   : > { %p530_p5 = pnand %p529_p2, %p523_p6 }
  0x4a   : > { %533 = shalt.err (!%p530_p5)
}
  0x4b   : > { %410 = dma.hbm_to_vmem [thread:$0]  (!%p721_p0), %s766_s19, 32, %s170_s26, %s158_s30  }
  0x4c   : > { %p877_p13 = scmp.ne.s32.totalorder %s876_s15, 0 }
  0x4d   : > { %s791_s18 = sand.u32 (!%p877_p13), 1, %s604_s10   ;;  %p878_p3 = scmp.ne.s32.totalorder (!%p877_p13), %s871_s21, 0 }
  0x4e   : > { %178 = sbr.rel (%p877_p13) target bundleno = 158 (0x9e), region = 28  ;;  %s389_s20 = sshll.u32 (!%p877_p13), %s791_s18, 2 }
  0x4f   : > { %s181_s4 = scalar_lea.sflag (!%p877_p13), [#allocation3], %s791_s18  ;;  %s184_s6 = scalar_lea.vmem (!%p877_p13), [#allocation2], %s389_s20 }
  0x55   : > { %587 = dma.done.wait (%p878_p3), %s181_s4, 64  }
  0x56   : > { %589 = vsyncadd (%p878_p3), %s181_s4, 4294967232  ;;  %s390_s5 = sshll.u32 %s791_s18, 1  ;;  %s190_s15 = scalar_lea.sflag [#allocation6], %s791_s18 }
  0x57   : > { %s193_s19 = scalar_lea.vmem [#allocation5], %s390_s5 }
  0x58   : > { %591 = dma.done.wait (%p878_p3), %s190_s15, 32  }
  0x59   : > { %593 = vsyncadd (%p878_p3), %s190_s15, 4294967264  ;;  %v219_v0 = vld [vmem:[%s193_s19] sm:$0x3]  ;;  %v221_v1 = vld [vmem:[%s184_s6] sm:$0x3]  ;;  %vm242_vm2 = vcmask 1041408  }
  0x5a   : > { %v392_v2 = vld [vmem:[%s184_s6 + $0x2] sm:$0x3]  ;;  %vm220_vm0 = vcmp.ne.s32.totalorder %v219_v0, 4294967295  ;;  %vm232_vm1 = vcmp.eq.s32.totalorder %v219_v0, 1  ;;  %v626_v4 = vmov 0.0   ;;  %s391_s21 = sshll.u32 %s791_s18, 3 }
  0x5b   : > { %v224_v3 = vmax.f32 %v221_v1, %v392_v2  ;;  %v234_v5 = vsel %vm232_vm1, 1.0, %v626_v4  ;;  %s218_s26 = scalar_lea.vmem [#allocation7], %s391_s21  ;;  %v233_v23 = vsel %vm232_vm1, %v392_v2, 0.0  ;;  %s394_s27 = sshll.u32 %s612_s12, 7 }
  0x5c   : > { %v241_v8 = vsel %vm220_vm0, %v234_v5, 0.0  ;;  %s274_s30 = sshll.u32 %s218_s26, 4  ;;  %s818_s3 = scalar_lea.hbm %s867_s2, %s394_s27  ;;  %s813_s30 = int_to_ptr.vmem [resolvable:$true] %s274_s30 }
  0x5d   : > { %v225_v6 = vsub.f32 %v221_v1, %v224_v3  ;;  %v228_v7 = vsub.f32 %v392_v2, %v224_v3  ;;  %v251_v9 = vsel %vm242_vm2, %v241_v8, 0.0  ;;  %s260_s25 = scalar_lea.sflag [#allocation4], %s791_s18  ;;  %s534_s7 = scalar_lea.vmem %s813_s30, 128 }
  0x5e   : > { %v252_v12 = vrot.slane %v251_v9, 4  ;;  %p535_p8 = scmp.ne.s32.totalorder %s813_s30, %s534_s7  ;;  %p879_p0 = scmp.ne.s32.totalorder %s872_s22, 0 }
  0x5f   : > { %v226_v10 = vmul.f32 1.442695, %v225_v6  ;;  %v229_v11 = vmul.f32 1.442695, %v228_v7  ;;  %s627_s12 = smov [#allocation7]  }
  0x60   : > { %v253_v13 = vadd.f32 %v252_v12, %v251_v9  ;;  %p536_p11 = pnand %p535_p8, %p879_p0  ;;  %s538_s8 = sshll.u32 %s627_s12, 4  ;;  %s539_s8 = int_to_ptr.vmem [resolvable:$false] %s538_s8 }
  0x61   : > { %468 = vpow2.f32 %v226_v10  ;;  %s540_s16 = scalar_lea.vmem %s539_s8, 256  ;;  %p541_p7 = scmp.lt.s32.totalorder %s813_s30, %s539_s8 }
  0x62   : > { %470 = vpow2.f32 %v229_v11  ;;  %v254_v14 = vrot.slane %v253_v13, 2  ;;  %p537_p4 = pneg %p536_p11  ;;  %p542_p10 = scmp.lt.s32.totalorder %s540_s16, %s534_s7 }
  0x64   : > { %v255_v15 = vadd.f32 %v254_v14, %v253_v13  ;;  %p543_p12 = por %p542_p10, %p541_p7 }
  0x66   : > { %v256_v16 = vrot.slane %v255_v15, 1  ;;  %p544_p9 = pnand %p543_p12, %p537_p4 }
  0x68   : > { %v257_v17 = vadd.f32 %v256_v16, %v255_v15 }
  0x6a   : > { %258 = vst [vmem:[%s218_s26 + $0x1] sm:$0x1] %v257_v17 }
  0x6b   : > { %v469_v18 = vpop.eup %468 }
  0x6c   : > { %v471_v19 = vpop.eup %470 }
  0x6d   : > { %v231_v20 = vadd.f32 %v471_v19, %v469_v18 }
  0x6f   : > { %472 = vlog2.f32 %v231_v20 }
  0x79   : > { %v473_v21 = vpop.eup %472 }
  0x7a   : > { %v236_v22 = vmul.f32 0.6931472, %v473_v21 }
  0x7c   : > { %v237_v24 = vadd.f32 %v236_v22, %v224_v3 }
  0x7e   : > { %v238_v25 = vsub.f32 %v237_v24, %v233_v23 }
  0x80   : > { %v239_v26 = vmul.f32 %v238_v25, %v234_v5 }
  0x82   : > { %v240_v27 = vsel %vm220_vm0, %v239_v26, 0.0 }
  0x83   : > { %v243_v28 = vsel %vm242_vm2, %v240_v27, 0.0 }
  0x84   : > { %v244_v29 = vrot.slane %v243_v28, 4 }
  0x86   : > { %v245_v30 = vadd.f32 %v244_v29, %v243_v28 }
  0x88   : > { %v246_v31 = vrot.slane %v245_v30, 2 }
  0x8a   : > { %v247_v32 = vadd.f32 %v246_v31, %v245_v30 }
  0x8c   : > { %v248_v33 = vrot.slane %v247_v32, 1 }
  0x8e   : > { %v249_v34 = vadd.f32 %v248_v33, %v247_v32 }
  0x90   : > { %250 = vst [vmem:[%s218_s26] sm:$0x1] %v249_v34 }
  0x91   : > { %547 = shalt.err (!%p544_p9)
}
  0x92   : > { %s548_s18 = scalar_lea.hbm %s818_s3, 128  ;;  %s552_s6 = scalar_lea.hbm %s867_s2, 256 }
  0x93   : > { %p549_p1 = scmp.ne.s32.totalorder %s818_s3, %s548_s18  ;;  %p553_p5 = scmp.lt.u32.totalorder %s818_s3, %s867_s2 }
  0x94   : > { %p554_p13 = scmp.lt.u32.totalorder %s552_s6, %s548_s18  ;;  %p556_p8 = scmp.lt.u32.totalorder %s548_s18, %s818_s3 }
  0x95   : > { %p550_p6 = pnand %p549_p1, %p879_p0 }
  0x96   : > { %p555_p3 = por %p554_p13, %p553_p5 }
  0x97   : > { %p551_p2 = pneg %p550_p6 }
  0x98   : > { %p557_p11 = por %p556_p8, %p555_p3 }
  0x9a   : > { %p558_p4 = pnand %p557_p11, %p551_p2 }
  0x9c   : > { %561 = shalt.err (!%p558_p4)
}
  0x9d   : > { %402 = dma.vmem_to_hbm [thread:$0]  (%p879_p0), %s813_s30, 128, %s818_s3, %s260_s25  }
  0x9e PF: > { %s286_s19 = sand.u32 1, %s600_s9   ;;  %p880_p7 = scmp.ne.s32.totalorder %s873_s24, 0 }
  0x9f   : > { %p881_p10 = scmp.ge.s32.totalorder %s620_s14, 2  ;;  %s287_s21 = scalar_lea.sflag [#allocation4], %s286_s19 }
  0xa1   : > { %p412_p12 = pnand %p881_p10, %p880_p7 }
  0xa3   : > { %595 = dma.done.wait (!%p412_p12), %s287_s21, 128  }
  0xa4   : > { %597 = vsyncadd (!%p412_p12), %s287_s21, 4294967168  ;;  %s21_s14 = sadd.s32 1, %s620_s14   ;;  %s882_s9 = smov %s604_s10 }
  0xa5   : > { %p18_p9 = scmp.ge.s32.totalorder %s21_s14, 4   ;;  %s883_s10 = smov %s608_s11 }
  0xa6   : > { %s884_s11 = smov %s699_s23  ;;  %s885_s12 = smov %s616_s13 }
  0xa7   : > { %s886_s13 = smov %s888_s17  ;;  %20 = sbr.rel (!%p18_p9) target bundleno = 8 (0x8), region = 87 }
  0xae   :  { %292 = vsyncpa [#allocation3], 1 }
  0xaf   :  { %294 = vsyncpa [#allocation3 + $0x1], 1 }
  0xb0   :  { %295 = vsyncpa [#allocation6], 1 }
  0xb1   :  { %297 = vsyncpa [#allocation6 + $0x1], 1 }
  0xb2   :  { %298 = vsyncpa [#allocation4], 1 }
  0xb3   :  { %300 = vsyncpa [#allocation4 + $0x1], 1 }

</bundles_post_ra>
